<compile_context>
chip_gen: v7x
topology: tpu7x:2x2x1
jax: 0.10.0
libtpu: 0.0.40
codegen_flags: <defaults>
</compile_context>

<pallas_src>
import jax
import jax.numpy as jnp
from jax import lax
from jax.experimental import pallas as pl
from jax.experimental.pallas import tpu as pltpu

N_FEATURES = 512   # resnet18 fc.in_features
N_HEADS = 4
HIDDEN = 32        # per-head width after the composed affine (the Linear(64,32) output)
HEAD_OUT = 2       # per-head logits


# ----------------------------------------------------------------------------------
# Plain-JAX resnet18 backbone (eval-mode BatchNorm, deterministic synthetic weights).
# TODO(synk): backbone is an external pretrained torchvision model; its convs stay in
#             plain JAX, only the heads (defined by FourParallelNet) are a Pallas kernel.
# Note: shared_fc12 / shared_fc34 are defined by the module but never used in forward().
# ----------------------------------------------------------------------------------
def _conv(x, w, stride, pad):
    return lax.conv_general_dilated(
        x, w, (stride, stride), [(pad, pad), (pad, pad)],
        dimension_numbers=("NCHW", "OIHW", "NCHW"))


def _bn(x, p):
    gamma, beta, mean, var = p
    inv = gamma / jnp.sqrt(var + 1e-5)
    return x * inv[None, :, None, None] + (beta - mean * inv)[None, :, None, None]


def _maxpool3x3s2(x):
    return lax.reduce_window(x, -jnp.inf, lax.max, (1, 1, 3, 3), (1, 1, 2, 2),
                             [(0, 0), (0, 0), (1, 1), (1, 1)])


def _basic_block(x, p, stride):
    out = jnp.maximum(_bn(_conv(x, p["conv1"], stride, 1), p["bn1"]), 0.0)
    out = _bn(_conv(out, p["conv2"], 1, 1), p["bn2"])
    if "down_conv" in p:
        idn = _bn(_conv(x, p["down_conv"], stride, 0), p["down_bn"])
    else:
        idn = x
    return jnp.maximum(out + idn, 0.0)


def resnet18_features(x, params):
    x = jnp.maximum(_bn(_conv(x, params["conv1"], 2, 3), params["bn1"]), 0.0)
    x = _maxpool3x3s2(x)
    for li, blocks in enumerate(params["layers"]):
        for bi, bp in enumerate(blocks):
            stride = 2 if (li > 0 and bi == 0) else 1
            x = _basic_block(x, bp, stride)
    # adaptive avg pool (1,1) + flatten; net.fc is Identity -> (B, 512)
    return jnp.mean(x, axis=(2, 3))


def _init_backbone(key):
    keys = iter(jax.random.split(key, 32))

    def conv_w(co, ci, k):
        fan_in = ci * k * k
        return jax.random.normal(next(keys), (co, ci, k, k), jnp.float32) * (2.0 / fan_in) ** 0.5

    def bn_p(c):
        return (jnp.ones((c,), jnp.float32), jnp.zeros((c,), jnp.float32),
                jnp.zeros((c,), jnp.float32), jnp.ones((c,), jnp.float32))

    params = {"conv1": conv_w(64, 3, 7), "bn1": bn_p(64), "layers": []}
    cin = 64
    for cout in (64, 128, 256, 512):
        blocks = []
        for bi in range(2):
            stride = 2 if (cout != 64 and bi == 0) else 1
            cin_b = cin if bi == 0 else cout
            bp = {"conv1": conv_w(cout, cin_b, 3), "bn1": bn_p(cout),
                  "conv2": conv_w(cout, cout, 3), "bn2": bn_p(cout)}
            if bi == 0 and (stride != 1 or cin != cout):
                bp["down_conv"] = conv_w(cout, cin, 1)
                bp["down_bn"] = bn_p(cout)
            blocks.append(bp)
        params["layers"].append(blocks)
        cin = cout
    return params


# ----------------------------------------------------------------------------------
# Pallas kernel: all four heads, fused, one invocation.
#   stage 1: feat (B,512) @ composed-weights (512, 4*32) + bias, ReLU    [f32 accum]
#   stage 2: (B,128) @ block-diagonal W5 (128, 4*2) + bias -> (B, 8)     [f32 accum]
# ----------------------------------------------------------------------------------
def _heads_kernel(feat_ref, wc_ref, bc_ref, w5_ref, b5_ref, out_ref):
    # bf16 cast of the features happens here (fused; no wrapper-side bf16 copy in HBM).
    feat_bf16 = feat_ref[...].astype(jnp.bfloat16)
    # Composed affine for all 4 heads at once (bf16 operands, f32 accumulation).
    h = jnp.dot(feat_bf16, wc_ref[...], preferred_element_type=jnp.float32)       # (B, 128)
    h = jnp.maximum(h + bc_ref[...], 0.0)             # bias add + ReLU in f32 (v5e-safe)
    # Block-diagonal projection: one matmul for all heads' Linear(32, 2).
    o = jnp.dot(h.astype(jnp.bfloat16), w5_ref[...],
                preferred_element_type=jnp.float32) + b5_ref[...]                  # (B, 8)
    out_ref[...] = o.astype(out_ref.dtype)


def four_heads_pallas(feat, composed):
    """feat: (B, 512) f32.  composed: (Wc (512,128) bf16, bc (1,128) f32,
    W5 block-diag (128,8) bf16, b5 (1,8) f32).  Returns (4, B, 2) f32."""
    wc, bc, w5, b5 = composed
    B = feat.shape[0]
    vmem = pl.BlockSpec(memory_space=pltpu.MemorySpace.VMEM)
    out = pl.pallas_call(
        _heads_kernel,
        out_shape=jax.ShapeDtypeStruct((B, N_HEADS * HEAD_OUT), jnp.float32),
        in_specs=[vmem] * 5,
        out_specs=vmem,
    )(feat, wc, bc, w5, b5)
    # Lane-packed (B, 8) slab -> (4, B, 2); reshape/transpose is wrapper-side plumbing.
    return jnp.transpose(out.reshape(B, N_HEADS, HEAD_OUT), (1, 0, 2))


# ----------------------------------------------------------------------------------
# Head parameters: per-head raw (matmul-form) params + one-time composition.
# ----------------------------------------------------------------------------------
def _init_heads(key):
    nf = N_FEATURES
    keys = iter(jax.random.split(key, 40))

    def nrm(shape, fan_in):
        return jax.random.normal(next(keys), shape, jnp.float32) * (1.0 / fan_in) ** 0.5

    heads = []
    for _ in range(N_HEADS):
        c1 = nrm((nf // 2, nf, 3, 3), nf * 9)               # Conv2d(512, 256, 3, padding=1)
        c2 = nrm((nf // 4, nf // 2, 3, 3), (nf // 2) * 9)   # Conv2d(256, 128, 3, padding=1)
        c3 = nrm((nf // 8, nf // 4, 3, 3), (nf // 4) * 9)   # Conv2d(128, 64, 3, padding=1)
        l1 = nrm((32, nf // 8), nf // 8)                    # Linear(64, 32)
        l2 = nrm((2, 32), 32)                               # Linear(32, 2)
        heads.append({
            # Center taps of the padding=1 3x3 convs: exact equivalence on 1x1 spatial input.
            "W1": c1[:, :, 1, 1].T, "b1": nrm((nf // 2,), nf * 9),
            "W2": c2[:, :, 1, 1].T, "b2": nrm((nf // 4,), (nf // 2) * 9),
            "W3": c3[:, :, 1, 1].T, "b3": nrm((nf // 8,), (nf // 4) * 9),
            "W4": l1.T,             "b4": nrm((32,), nf // 8),
            "W5": l2.T,             "b5": nrm((2,), 32),
        })
    return heads


def _compose_heads(raw_heads):
    """Done ONCE at parameter-prep time (not per call).

    The 512->256->128->64->32 chain has no nonlinearity, so it collapses to a single
    affine per head:  Wc = W1@W2@W3@W4,  bc = ((b1@W2 + b2)@W3 + b3)@W4 + b4.
    Heads are then concatenated along the output dim (512, 4*32), and the four (32,2)
    output projections become one block-diagonal (128, 8) matrix.
    """
    wcs, bcs, w5s, b5s = [], [], [], []
    for p in raw_heads:
        wc = p["W1"] @ p["W2"] @ p["W3"] @ p["W4"]                                      # (512, 32)
        bc = ((p["b1"] @ p["W2"] + p["b2"]) @ p["W3"] + p["b3"]) @ p["W4"] + p["b4"]    # (32,)
        wcs.append(wc)
        bcs.append(bc)
        w5s.append(p["W5"])
        b5s.append(p["b5"])
    wc_all = jnp.concatenate(wcs, axis=1)                 # (512, 128)
    bc_all = jnp.concatenate(bcs, axis=0)[None, :]        # (1, 128)
    w5_bd = jnp.zeros((N_HEADS * HIDDEN, N_HEADS * HEAD_OUT), jnp.float32)
    for h, w5 in enumerate(w5s):
        w5_bd = w5_bd.at[h * HIDDEN:(h + 1) * HIDDEN,
                         h * HEAD_OUT:(h + 1) * HEAD_OUT].set(w5)   # (128, 8) block-diag
    b5_all = jnp.concatenate(b5s, axis=0)[None, :]        # (1, 8)
    # bf16 operands for the MXU; biases stay f32 (elementwise work kept in f32).
    return (wc_all.astype(jnp.bfloat16), bc_all.astype(jnp.float32),
            w5_bd.astype(jnp.bfloat16), b5_all.astype(jnp.float32))


def _heads_ref(feat, raw_heads):
    """Layer-by-layer f32 reference (faithful to the module's per-head Sequential)."""
    outs = []
    for p in raw_heads:
        z = feat @ p["W1"] + p["b1"]
        z = z @ p["W2"] + p["b2"]
        z = z @ p["W3"] + p["b3"]
        z = jnp.maximum(z @ p["W4"] + p["b4"], 0.0)
        outs.append(z @ p["W5"] + p["b5"])
    return jnp.stack(outs, axis=0)


if __name__ == "__main__":
    root = jax.random.PRNGKey(0)
    k_bb, k_heads, k_x = jax.random.split(root, 3)

    backbone_params = _init_backbone(k_bb)
    raw_heads = _init_heads(k_heads)
    composed = _compose_heads(raw_heads)   # one-time algebraic composition + bf16 cast

    # NCHW input like PyTorch; small spatial size (resnet18 stem + 4 stages -> 1x1).
    x = jax.random.normal(k_x, (2, 3, 32, 32), jnp.float32)

    feat = resnet18_features(x, backbone_params)          # (2, 512)
    out = four_heads_pallas(feat, composed)               # (4, 2, 2)
    out = jax.block_until_ready(out)

    hom_is_positive, hom_type, het_is_positive, het_type = out[0], out[1], out[2], out[3]

    ref = _heads_ref(feat, raw_heads)
    assert out.shape == (N_HEADS, 2, HEAD_OUT)
    assert hom_is_positive.shape == (2, HEAD_OUT)
    # Tolerance reflects bf16 MXU operands (f32 accumulation) + affine recomposition.
    assert jnp.allclose(out, ref, rtol=2e-2, atol=2e-2), (
        f"max abs err {float(jnp.max(jnp.abs(out - ref)))}")

    print("KERNEL_OK")
</pallas_src>

<mosaic_0001>
module attributes {stable_mosaic.version = 11 : i64} {
  func.func @_heads_kernel(%arg0: memref<2x512xf32, #tpu.memory_space<vmem>>, %arg1: memref<512x128xbf16, #tpu.memory_space<vmem>>, %arg2: memref<1x128xf32, #tpu.memory_space<vmem>>, %arg3: memref<128x8xbf16, #tpu.memory_space<vmem>>, %arg4: memref<1x8xf32, #tpu.memory_space<vmem>>, %arg5: memref<2x8xf32, #tpu.memory_space<vmem>>) attributes {dimension_semantics = [], scalar_prefetch = 0 : i64, scratch_operands = 0 : i64, tpu.core_type = #tpu.core_type<tc>} {
    %c0 = arith.constant 0 : index
    %c0_0 = arith.constant 0 : index
    %0 = vector.load %arg0[%c0, %c0_0] : memref<2x512xf32, #tpu.memory_space<vmem>>, vector<2x512xf32>
    %1 = arith.truncf %0 : vector<2x512xf32> to vector<2x512xbf16>
    %c0_1 = arith.constant 0 : index
    %c0_2 = arith.constant 0 : index
    %2 = vector.load %arg1[%c0_1, %c0_2] : memref<512x128xbf16, #tpu.memory_space<vmem>>, vector<512x128xbf16>
    %cst = arith.constant dense<0.000000e+00> : vector<2x128xf32>
    %3 = tpu.matmul %1, %2, %cst {dimension_numbers = #tpu.dot_dimension_numbers<[1], [0], [0], [1], [0, 0, 1, 1], [], []>} : vector<2x512xbf16>, vector<512x128xbf16>, vector<2x128xf32> -> vector<2x128xf32>
    %c0_3 = arith.constant 0 : index
    %c0_4 = arith.constant 0 : index
    %4 = vector.load %arg2[%c0_3, %c0_4] : memref<1x128xf32, #tpu.memory_space<vmem>>, vector<1x128xf32>
    %5 = vector.broadcast %4 : vector<1x128xf32> to vector<2x128xf32>
    %6 = arith.addf %3, %5 : vector<2x128xf32>
    %cst_5 = arith.constant 0.000000e+00 : f32
    %7 = vector.broadcast %cst_5 : f32 to vector<2x128xf32>
    %8 = arith.maximumf %6, %7 : vector<2x128xf32>
    %9 = arith.truncf %8 : vector<2x128xf32> to vector<2x128xbf16>
    %c0_6 = arith.constant 0 : index
    %c0_7 = arith.constant 0 : index
    %10 = vector.load %arg3[%c0_6, %c0_7] : memref<128x8xbf16, #tpu.memory_space<vmem>>, vector<128x8xbf16>
    %cst_8 = arith.constant dense<0.000000e+00> : vector<2x8xf32>
    %11 = tpu.matmul %9, %10, %cst_8 {dimension_numbers = #tpu.dot_dimension_numbers<[1], [0], [0], [1], [0, 0, 1, 1], [], []>} : vector<2x128xbf16>, vector<128x8xbf16>, vector<2x8xf32> -> vector<2x8xf32>
    %c0_9 = arith.constant 0 : index
    %c0_10 = arith.constant 0 : index
    %12 = vector.load %arg4[%c0_9, %c0_10] : memref<1x8xf32, #tpu.memory_space<vmem>>, vector<1x8xf32>
    %13 = vector.broadcast %12 : vector<1x8xf32> to vector<2x8xf32>
    %14 = arith.addf %11, %13 : vector<2x8xf32>
    %c0_11 = arith.constant 0 : index
    %c0_12 = arith.constant 0 : index
    %15 = vector.load %arg5[%c0_11, %c0_12] : memref<2x8xf32, #tpu.memory_space<vmem>>, vector<2x8xf32>
    tpu.vector_store %arg5[%c0_11, %c0_12], %14 {strides = array<i32>} : memref<2x8xf32, #tpu.memory_space<vmem>>, vector<2x8xf32>,
    return
  }
}

</mosaic_0001>

<bundles_post_ra>
// kernel: tpu_custom_call.1
= control target key start
LH: loop header
LB: loop body
LE: loop exit
PB: predicated region body
PF: predicated region fallthrough
CT: control target
= control target key end

     0   :  { %10 = vsyncpa [#allocation3], 0  ;;  %s841_s0 = inlined_call_operand.vmem [shape: f32[2,512], index: 0, kind: input, shape index: {}]   ;;  %s842_s1 = inlined_call_operand.hbm [shape: bf16[512,128], index: 1, kind: input, shape index: {}]   ;;  %s843_s2 = inlined_call_operand.vmem [shape: f32[1,128], index: 2, kind: input, shape index: {}]   ;;  %s844_s3 = inlined_call_operand.vmem [shape: bf16[128,8], index: 3, kind: input, shape index: {}]   ;;  %s845_s4 = inlined_call_operand.vmem [shape: f32[1,8], index: 4, kind: input, shape index: {}]   ;;  %s846_s5 = inlined_call_operand.hbm [shape: f32[2,8], index: 5, kind: output, shape index: {}]  }
   0x1   :  { %11 = vsyncpa [#allocation4], 0  ;;  %s747_s18 = smov [#allocation2]   ;;  %s699_s22 = scalar_lea.hbm %s842_s1, 4096 }
   0x2   :  { %s19_s19 = sshll.u32 %s747_s18, 4  ;;  %p700_p0 = scmp.ne.s32.totalorder %s842_s1, %s699_s22  ;;  %s20_s19 = int_to_ptr.vmem [resolvable:$true] %s19_s19 }
   0x3   :  { %p703_p1 = scmp.lt.u32.totalorder %s699_s22, %s842_s1 }
   0x5   :  { %p705_p2 = pnand %p703_p1, %p700_p0 }
   0x7   :  { %708 = shalt.err (!%p705_p2)
}
   0x8   :  { %s709_s27 = scalar_lea.vmem %s20_s19, 4096  ;;  %p714_p4 = scmp.lt.s32.totalorder %s20_s19, %s20_s19 }
   0x9   :  { %p710_p3 = scmp.ne.s32.totalorder %s20_s19, %s709_s27  ;;  %p715_p5 = scmp.lt.s32.totalorder %s709_s27, %s709_s27 }
   0xb   :  { %p716_p6 = por %p715_p5, %p714_p4 }
   0xd   :  { %p717_p7 = pnand %p716_p6, %p710_p3 }
   0xf   :  { %720 = shalt.err (!%p717_p7)
}
  0x10   :  { %s748_s28 = smov 64   ;;  %s749_s29 = smov 4  }
  0x11   :  { %25 = dma.hbm_to_vmem [thread:$0]  %s842_s1, 4096, %s20_s19, [#allocation3], %s748_s28, %s748_s28, %s749_s29  }
  0x12   :  { %743 = dma.done.wait [#allocation3], 4096  }
  0x13   :  { %744 = vsyncadd [#allocation3], 4294963200  ;;  %v658_v0 = vld [vmem:[#allocation2 + $0x40] sm:$0xff]   ;;  %v662_v4 = vld [vmem:[#allocation2 + $0x48] sm:$0xff]   ;;  %v750_v22 = vmov 1983009808   ;;  %v42_v24 = vlaneseq }
  0x14   :  { %v659_v1 = vld [vmem:[#allocation2 + $0xc0] sm:$0xff]   ;;  %578 = vmatprep.subr.bf16.mxu0 %v658_v0  ;;  %v663_v5 = vld [vmem:[#allocation2 + $0xc8] sm:$0xff]   ;;  %v666_v8 = vld [vmem:[#allocation2 + $0x50] sm:$0xff]   ;;  %v40_v23 = vunpack.c.l.s4 %v750_v22  ;;  %v751_v41 = vmov 0.0   ;;  %vm752_vm0 = vmmov 0   ;;  %s753_s26 = smov [#allocation5]  }
  0x15   :  { %v660_v2 = vld [vmem:[#allocation2] sm:$0xff]   ;;  %600 = vmatprep.subr.bf16.mxu1 %v659_v1  ;;  %v664_v6 = vld [vmem:[#allocation2 + $0x8] sm:$0xff]   ;;  %v667_v9 = vld [vmem:[#allocation2 + $0xd0] sm:$0xff]   ;;  %v43_v30 = vshrl.u32 %v42_v24, 7  ;;  %vm519_vm1 = vcmask 58368  }
  0x16   :  { %v661_v3 = vld [vmem:[#allocation2 + $0x80] sm:$0xff]   ;;  %579 = vmatpush3.bf16.msra.mxu0 %v660_v2  ;;  %v665_v7 = vld [vmem:[#allocation2 + $0x88] sm:$0xff]   ;;  %v668_v10 = vld [vmem:[#allocation2 + $0x10] sm:$0xff]   ;;  %v41_v29 = vunpack.c.0.s8 %v40_v23 }
  0x17   :  { %601 = vmatpush3.bf16.msra.mxu1 %v661_v3  ;;  %580 = vmatprep.subr.bf16.mxu0 %v662_v4  ;;  %v669_v11 = vld [vmem:[#allocation2 + $0x90] sm:$0xff]   ;;  %v670_v12 = vld [vmem:[#allocation2 + $0x58] sm:$0xff]   ;;  %v674_v16 = vld [vmem:[#allocation2 + $0x60] sm:$0xff]  }
  0x18   :  { %602 = vmatprep.subr.bf16.mxu1 %v663_v5  ;;  %v671_v13 = vld [vmem:[#allocation2 + $0xd8] sm:$0xff]   ;;  %v675_v17 = vld [vmem:[#allocation2 + $0xe0] sm:$0xff]   ;;  %v678_v20 = vld [vmem:[#allocation2 + $0x68] sm:$0xff]   ;;  %v44_v35 = vsub.s32 %v41_v29, %v43_v30 }
  0x19   :  { %v672_v14 = vld [vmem:[#allocation2 + $0x18] sm:$0xff]   ;;  %v676_v18 = vld [vmem:[#allocation2 + $0x20] sm:$0xff]   ;;  %v679_v21 = vld [vmem:[#allocation2 + $0xe8] sm:$0xff]  }
  0x1a   :  { %581 = vmatpush3.bf16.msra.mxu0 %v664_v6  ;;  %v673_v15 = vld [vmem:[#allocation2 + $0x98] sm:$0xff]   ;;  %v677_v19 = vld [vmem:[#allocation2 + $0xa0] sm:$0xff]   ;;  %v680_v25 = vld [vmem:[#allocation2 + $0x28] sm:$0xff]  }
  0x1b   :  { %603 = vmatpush3.bf16.msra.mxu1 %v665_v7  ;;  %582 = vmatprep.subr.bf16.mxu0 %v666_v8  ;;  %v681_v26 = vld [vmem:[#allocation2 + $0xa8] sm:$0xff]   ;;  %v682_v27 = vld [vmem:[#allocation2 + $0x70] sm:$0xff]   ;;  %v686_v33 = vld [vmem:[#allocation2 + $0x78] sm:$0xff]  }
  0x1c   :  { %604 = vmatprep.subr.bf16.mxu1 %v667_v9  ;;  %v683_v28 = vld [vmem:[#allocation2 + $0xf0] sm:$0xff]   ;;  %v687_v34 = vld [vmem:[#allocation2 + $0xf8] sm:$0xff]   ;;  %v36_v38 = vld [vmem:[%s841_s0] sm:$0xff] }
  0x1d   :  { %v684_v31 = vld [vmem:[#allocation2 + $0x30] sm:$0xff]   ;;  %v688_v36 = vld [vmem:[#allocation2 + $0x38] sm:$0xff]   ;;  %v45_v39 = vrot.slane %v36_v38, %v44_v35  ;;  %v38_v40 = vcombine.high %v36_v38, %v36_v38  ;;  %v691_v47 = vld [vmem:[%s844_s3] sm:$0xff]  }
  0x1e   :  { %583 = vmatpush3.bf16.msra.mxu0 %v668_v10  ;;  %v685_v32 = vld [vmem:[#allocation2 + $0xb0] sm:$0xff]   ;;  %v689_v37 = vld [vmem:[#allocation2 + $0xb8] sm:$0xff]   ;;  %v692_v50 = vld [vmem:[%s844_s3 + $0x8] sm:$0xff]  }
  0x1f   :  { %605 = vmatpush3.bf16.msra.mxu1 %v669_v11  ;;  %584 = vmatprep.subr.bf16.mxu0 %v670_v12  ;;  %v53_v42 = vcombine.high %v45_v39, %v45_v39  ;;  %v52_v43 = vrot.slane %v38_v40, %v44_v35  ;;  %v59_v44 = vpack.c.bf16 %v45_v39, %v45_v39  ;;  %v693_v51 = vld [vmem:[%s844_s3 + $0x10] sm:$0xff]   ;;  %v694_v52 = vld [vmem:[%s844_s3 + $0x18] sm:$0xff]   ;;  %v695_v53 = vld [vmem:[%s844_s3 + $0x20] sm:$0xff]  }
  0x20   :  { %606 = vmatprep.subr.bf16.mxu1 %v671_v13  ;;  %v696_v54 = vld [vmem:[%s844_s3 + $0x28] sm:$0xff]   ;;  %v697_v55 = vld [vmem:[%s844_s3 + $0x30] sm:$0xff]   ;;  %v698_v56 = vld [vmem:[%s844_s3 + $0x38] sm:$0xff]  }
  0x21   :  { %v60_v45 = vpack.c.bf16 %v53_v42, %v53_v42  ;;  %v54_v46 = vcombine.high %v52_v43, %v52_v43  ;;  %v61_v48 = vpack.c.bf16 %v52_v43, %v52_v43  ;;  %v536_v58 = vld [vmem:[%s843_s2] ss:$0 sm:$0xff]  ;;  %s527_s2 = sshll.u32 %s753_s26, 4  ;;  %s528_s2 = int_to_ptr.vmem [resolvable:$true] %s527_s2 }
  0x22   :  { %585 = vmatpush3.bf16.msra.mxu0 %v672_v14  ;;  %v569_v8 = vld [vmem:[%s845_s4] ss:$0 sm:$0xff]  ;;  %s721_s27 = scalar_lea.vmem %s528_s2, 32  ;;  %p726_p9 = scmp.lt.s32.totalorder %s528_s2, %s528_s2 }
  0x23   :  { %607 = vmatpush3.bf16.msra.mxu1 %v673_v15  ;;  %586 = vmatprep.subr.bf16.mxu0 %v674_v16  ;;  %v62_v49 = vpack.c.bf16 %v54_v46, %v54_v46  ;;  %p722_p8 = scmp.ne.s32.totalorder %s528_s2, %s721_s27  ;;  %p727_p10 = scmp.lt.s32.totalorder %s721_s27, %s721_s27 }
  0x24   :  { %608 = vmatprep.subr.bf16.mxu1 %v675_v17  ;;  %358 = vmatprep.mubr.bf16.mxu0 %v60_v45 }
  0x25   :  { %398 = vmatprep.mubr.bf16.mxu1 %v62_v49  ;;  %p728_p11 = por %p727_p10, %p726_p9 }
  0x26   :  { %587 = vmatpush3.bf16.msra.mxu0 %v676_v18 }
  0x27   :  { %609 = vmatpush3.bf16.msra.mxu1 %v677_v19  ;;  %588 = vmatprep.subr.bf16.mxu0 %v678_v20  ;;  %p729_p12 = pnand %p728_p11, %p722_p8 }
  0x28   :  { %610 = vmatprep.subr.bf16.mxu1 %v679_v21 }
  0x2a   :  { %589 = vmatpush3.bf16.msra.mxu0 %v680_v25 }
  0x2b   :  { %611 = vmatpush3.bf16.msra.mxu1 %v681_v26  ;;  %590 = vmatprep.subr.bf16.mxu0 %v682_v27 }
  0x2c   :  { %612 = vmatprep.subr.bf16.mxu1 %v683_v28 }
  0x2e   :  { %591 = vmatpush3.bf16.msra.mxu0 %v684_v31 }
  0x2f   :  { %613 = vmatpush3.bf16.msra.mxu1 %v685_v32  ;;  %592 = vmatprep.subr.bf16.mxu0 %v686_v33 }
  0x30   :  { %614 = vmatprep.subr.bf16.mxu1 %v687_v34 }
  0x32   :  { %593 = vmatpush3.bf16.msra.mxu0 %v688_v36 }
  0x33   :  { %615 = vmatpush3.bf16.msra.mxu1 %v689_v37  ;;  %631 = vmatprep.subr.bf16.mxu0 %v751_v41 }
  0x35   :  { %359 = vmatmul.mubr.bf16.vlgmr.msra.gmra.mrb[0].mxu0 %v59_v44 }
  0x36   :  { %632 = vmatpush3.bf16.msra.mxu0 %v691_v47  ;;  %399 = vmatmul.mubr.bf16.vlgmr.msra.gmra.mrb[0].mxu1 %v61_v48 }
  0x37   :  { %633 = vmatprep.subr.bf16.mxu0 %v751_v41  ;;  %647 = vmatprep.mubr.msk.bf16.mxu0 %vm752_vm0, %v751_v41 }
  0x3a   :  { %634 = vmatpush3.bf16.msra.mxu0 %v692_v50 }
  0x3b   :  { %635 = vmatprep.subr.bf16.mxu0 %v751_v41 }
  0x3e   :  { %636 = vmatpush3.bf16.msra.mxu0 %v693_v51 }
  0x3f   :  { %637 = vmatprep.subr.bf16.mxu0 %v751_v41 }
  0x42   :  { %638 = vmatpush3.bf16.msra.mxu0 %v694_v52 }
  0x43   :  { %639 = vmatprep.subr.bf16.mxu0 %v751_v41 }
  0x46   :  { %640 = vmatpush3.bf16.msra.mxu0 %v695_v53 }
  0x47   :  { %641 = vmatprep.subr.bf16.mxu0 %v751_v41 }
  0x4a   :  { %642 = vmatpush3.bf16.msra.mxu0 %v696_v54 }
  0x4b   :  { %643 = vmatprep.subr.bf16.mxu0 %v751_v41 }
  0x4e   :  { %644 = vmatpush3.bf16.msra.mxu0 %v697_v55 }
  0x4f   :  { %645 = vmatprep.subr.bf16.mxu0 %v751_v41 }
  0x52   :  { %646 = vmatpush3.bf16.msra.mxu0 %v698_v56 }
 0x108   :  { %v594_v57 = vpop.f32.mrb[0].mxu0 }
 0x109   :  { %v595_v59 = vpop.f32.mrb[1].mxu0  ;;  %v616_v60 = vpop.f32.mrb[0].mxu1 }
 0x10a   :  { %v596_v61 = vadd.f32 %v595_v59, %v594_v57  ;;  %v597_v62 = vpop.f32.mrb[2].mxu0  ;;  %v617_v63 = vpop.f32.mrb[1].mxu1 }
 0x10b   :  { %v598_v0 = vpop.f32.mrb[3].mxu0  ;;  %v618_v2 = vadd.f32 %v617_v63, %v616_v60  ;;  %v619_v3 = vpop.f32.mrb[2].mxu1 }
 0x10c   :  { %v361_v1 = vadd.f32 %v596_v61, %v536_v58  ;;  %v620_v4 = vpop.f32.mrb[3].mxu1 }
 0x10e   :  { %v401_v5 = vadd.f32 %v618_v2, %v361_v1 }
 0x110   :  { %v406_v6 = vmax.f32 %v401_v5, 0.0 }
 0x112   :  { %v407_v7 = vpack.c.bf16 %v406_v6, %v406_v6 }
 0x114   :  { %648 = vmatmul.mubr.bf16.vlgmr.msra.gmra.mrb[4].mxu0 %v407_v7 }
 0x1e7   :  { %v513_v9 = vpop.f32.mrb[4].mxu0 }
 0x1e8   :  { %v514_v10 = vadd.f32 %v569_v8, %v513_v9  ;;  %v649_v11 = vpop.f32.mrb[5].mxu0 }
 0x1e9   :  { %v516_v12 = vpop.f32.mrb[6].mxu0 }
 0x1ea   :  { %v650_v13 = vpop.f32.mrb[7].mxu0  ;;  %520 = vst.msk [vmem:[#allocation5] sm:$0x3] %vm519_vm1, %v514_v10 }
 0x1eb   :  { %732 = shalt.err (!%p729_p12)
}
 0x1ec   :  { %s733_s4 = scalar_lea.hbm %s846_s5, 32 }
 0x1ed   :  { %p734_p13 = scmp.ne.s32.totalorder %s846_s5, %s733_s4  ;;  %p737_p0 = scmp.lt.u32.totalorder %s733_s4, %s846_s5 }
 0x1ef   :  { %p739_p1 = pnand %p737_p0, %p734_p13 }
 0x1f1   :  { %742 = shalt.err (!%p739_p1)
}
 0x1f2   :  { %530 = dma.vmem_to_hbm [thread:$0]  %s528_s2, 32, %s846_s5, [#allocation4]  }
 0x1f3   :  { %745 = dma.done.wait [#allocation4], 32  }
 0x1f4   :  { %746 = vsyncadd [#allocation4], 4294967264 }
 0x1f5   :  { %534 = vsyncpa [#allocation3], 1 }
 0x1f6   :  { %535 = vsyncpa [#allocation4], 1 }

</bundles_post_ra>
